<compile_context>
chip_gen: v7x
topology: tpu7x:2x2x1
jax: 0.10.0
libtpu: 0.0.40
codegen_flags: <defaults>
</compile_context>

<pallas_src>
import functools

import jax
import jax.numpy as jnp
from jax.experimental import pallas as pl
from jax.experimental.pallas import tpu as pltpu


def _nce_softmax_loss_kernel(xn_ref, yn_ref, loss_ref, *, inv_t, tq, exp_in_bf16):
    """Per-row info-NCE loss for one query tile against the resident key set.

    xn_ref:   (tq, dim)  bf16 row-normalized queries (this tile)
    yn_ref:   (bsz, dim) bf16 row-normalized keys (resident across the grid)
    loss_ref: (1, 1, tq) f32 per-row losses (lane-dense output)
    """
    xn = xn_ref[...]                                                  # (tq, dim) bf16
    yn = yn_ref[...]                                                  # (bsz, dim) bf16

    # scores[i, j] = <xn_i, yn_j> / nce_t  -- NT contraction (no materialized
    # transpose), bf16 operands, f32 MXU accumulation.
    scores = jax.lax.dot_general(
        xn, yn,
        dimension_numbers=(((1,), (1,)), ((), ())),
        preferred_element_type=jnp.float32) * inv_t                   # (tq, bsz)

    # Positive (diagonal) logit from the SAME bf16 key rows used in the matmul:
    # slice the aligned rows of the resident key buffer (no extra HBM stream).
    row0 = pl.multiple_of(pl.program_id(0) * tq, tq)
    yd = yn_ref[pl.ds(row0, tq), :]                                   # (tq, dim) bf16
    diag = jnp.sum(xn.astype(jnp.float32) * yd.astype(jnp.float32),
                   axis=1, keepdims=True) * inv_t                     # (tq, 1)

    # Cross-entropy with labels = arange(bsz): loss_i = logsumexp_j(s_ij) - s_ii
    m = jnp.max(scores, axis=1, keepdims=True)                        # (tq, 1)
    z = scores - m
    if exp_in_bf16:
        z = z.astype(jnp.bfloat16)          # v6e/v7x: bf16 EUP transcendentals
    p = jnp.exp(z)
    lse = m + jnp.log(jnp.sum(p, axis=1, keepdims=True,
                              dtype=jnp.float32))                     # (tq, 1)

    # Lane-dense store: one small XLU transpose instead of tq masked stores.
    loss_ref[...] = jnp.transpose(lse - diag).reshape(1, 1, tq)


def _pick_tq(bsz, dim, vmem_budget):
    """Largest multiple-of-8 divisor of bsz whose per-step working set fits the
    VMEM budget (capped at 256 to keep MXU tiles reasonable)."""
    def working_set(t):
        return (bsz * dim * 2            # resident bf16 keys (single-buffered)
                + 2 * t * dim * 2        # double-buffered bf16 query tiles
                + 4 * t * bsz * 4)       # scores + softmax temporaries (f32)
    cap = 256
    while cap > 8 and working_set(cap) > int(0.75 * vmem_budget):
        cap //= 2
    best = None
    for t in range(8, min(cap, bsz) + 1, 8):
        if bsz % t == 0:
            best = t
    return best if best is not None else bsz


def nce_softmax_loss(x, y, nce_t, *, tq=None, exp_in_bf16=None):
    """Pallas implementation of NCESoftmaxLoss.forward(x, y) (mean loss)."""
    bsz, dim = x.shape
    assert y.shape == (bsz, dim)

    kind = jax.devices()[0].device_kind.lower()
    is_v5 = "v5" in kind
    is_v7 = "v7" in kind
    if exp_in_bf16 is None:
        exp_in_bf16 = not is_v5          # v5e has no bf16 EUP

    # Per-core VMEM budget with headroom: v7x has 64 MiB/core (and under the
    # "parallel" megacore split each core holds its own resident key copy);
    # v5e/v6e have 128 MiB.
    vmem_budget = (48 if is_v7 else 100) * 1024 * 1024

    if tq is None:
        tq = _pick_tq(bsz, dim, vmem_budget)
    assert bsz % tq == 0 and (tq % 8 == 0 or tq == bsz), (bsz, tq)
    num_tiles = bsz // tq

    # One-time f32 normalization (rsqrt, no divides), bf16 MXU operands.
    x32 = x.astype(jnp.float32)
    y32 = y.astype(jnp.float32)
    xn = (x32 * jax.lax.rsqrt(jnp.sum(x32 * x32, axis=1, keepdims=True))
          ).astype(jnp.bfloat16)
    yn = (y32 * jax.lax.rsqrt(jnp.sum(y32 * y32, axis=1, keepdims=True))
          ).astype(jnp.bfloat16)

    # VMEM limit derived from actual buffer sizes + headroom, clamped per-gen.
    need = (bsz * dim * 2                # resident bf16 keys (single buffer)
            + 2 * tq * dim * 2           # double-buffered query tiles
            + 4 * tq * bsz * 4           # scores + softmax temporaries
            + 2 * tq * 4                 # output blocks
            + (4 << 20))                 # compiler scratch headroom
    vmem_limit = int(min(vmem_budget, max(need, 32 * 1024 * 1024)))

    kernel = functools.partial(
        _nce_softmax_loss_kernel,
        inv_t=float(1.0 / nce_t), tq=tq, exp_in_bf16=bool(exp_in_bf16))

    per_row = pl.pallas_call(
        kernel,
        out_shape=jax.ShapeDtypeStruct((num_tiles, 1, tq), jnp.float32),
        grid=(num_tiles,),
        in_specs=[
            # Query tile marches along the grid.
            pl.BlockSpec((tq, dim), lambda i: (i, 0)),
            # Full key set: resident (constant index_map), single-buffered.
            pl.BlockSpec((bsz, dim), lambda i: (0, 0),
                         pipeline_mode=pl.Buffered(1)),
        ],
        out_specs=pl.BlockSpec((1, 1, tq), lambda i: (i, 0, 0)),
        compiler_params=pltpu.CompilerParams(
            dimension_semantics=("parallel",),
            vmem_limit_bytes=vmem_limit,
        ),
    )(xn, yn)

    # reduction='none' followed by .mean(); every (num_tiles*tq == bsz) entry
    # is a valid row loss (no padded rows by construction).
    return jnp.mean(per_row)


def _reference(x, y, nce_t):
    # Pure-JAX f32 reference mirroring the PyTorch module.
    xn = x / jnp.linalg.norm(x, axis=1, keepdims=True)
    yn = y / jnp.linalg.norm(y, axis=1, keepdims=True)
    scores = (xn @ yn.T) / nce_t
    labels = jnp.arange(x.shape[0])
    logp = jax.nn.log_softmax(scores, axis=-1)
    loss = -logp[jnp.arange(x.shape[0]), labels]
    return loss.mean()


if __name__ == "__main__":
    bsz, dim = 8, 32
    nce_t = 0.07

    key = jax.random.PRNGKey(0)
    kx, ky = jax.random.split(key)
    x = jax.random.normal(kx, (bsz, dim), dtype=jnp.float32)
    y = jax.random.normal(ky, (bsz, dim), dtype=jnp.float32)

    loss = nce_softmax_loss(x, y, nce_t)
    jax.block_until_ready(loss)

    ref = _reference(x, y, nce_t)
    # bf16 MXU operands / bf16 exp => small relative error; loose tolerance.
    assert jnp.allclose(loss, ref, rtol=5e-2, atol=5e-2), (loss, ref)

    print("KERNEL_OK")
</pallas_src>

<mosaic_0001>
module attributes {stable_mosaic.version = 11 : i64} {
  func.func @_nce_softmax_loss_kernel(%arg0: i32, %arg1: memref<8x32xbf16, #tpu.memory_space<vmem>>, %arg2: memref<8x32xbf16, #tpu.memory_space<vmem>>, %arg3: memref<1x1x8xf32, #tpu.memory_space<vmem>>) attributes {dimension_semantics = [#tpu.dimension_semantics<parallel>], iteration_bounds = array<i64: 1>, scalar_prefetch = 0 : i64, scratch_operands = 0 : i64, tpu.core_type = #tpu.core_type<tc>, window_params = [{transform_indices = @transform_0, window_bounds = array<i64: 8, 32>}, {pipeline_mode = #tpu.pipeline_mode<synchronous>, transform_indices = @transform_1, window_bounds = array<i64: 8, 32>}, {transform_indices = @transform_2, window_bounds = array<i64: 1, 1, 8>}]} {
    %c0 = arith.constant 0 : index
    %c0_0 = arith.constant 0 : index
    %0 = vector.load %arg1[%c0, %c0_0] : memref<8x32xbf16, #tpu.memory_space<vmem>>, vector<8x32xbf16>
    %c0_1 = arith.constant 0 : index
    %c0_2 = arith.constant 0 : index
    %1 = vector.load %arg2[%c0_1, %c0_2] : memref<8x32xbf16, #tpu.memory_space<vmem>>, vector<8x32xbf16>
    %cst = arith.constant dense<0.000000e+00> : vector<8x8xf32>
    %2 = tpu.matmul %0, %1, %cst {dimension_numbers = #tpu.dot_dimension_numbers<[1], [1], [0], [0], [0, 0, 1, 0], [], []>} : vector<8x32xbf16>, vector<8x32xbf16>, vector<8x8xf32> -> vector<8x8xf32>
    %cst_3 = arith.constant 14.2857141 : f32
    %3 = vector.broadcast %cst_3 : f32 to vector<8x8xf32>
    %4 = arith.mulf %2, %3 : vector<8x8xf32>
    %c8_i32 = arith.constant 8 : i32
    %5 = arith.muli %arg0, %c8_i32 : i32
    %6 = tpu.assume_multiple %5, 8 : i32
    %7 = arith.index_cast %6 : i32 to index
    %c0_4 = arith.constant 0 : index
    %8 = vector.load %arg2[%7, %c0_4] : memref<8x32xbf16, #tpu.memory_space<vmem>>, vector<8x32xbf16>
    %9 = arith.extf %0 : vector<8x32xbf16> to vector<8x32xf32>
    %10 = arith.extf %8 : vector<8x32xbf16> to vector<8x32xf32>
    %11 = arith.mulf %9, %10 : vector<8x32xf32>
    %cst_5 = arith.constant dense<0.000000e+00> : vector<8xf32>
    %12 = vector.multi_reduction <add>, %11, %cst_5 [1] : vector<8x32xf32> to vector<8xf32>
    %13 = vector.shape_cast %12 : vector<8xf32> to vector<8x1xf32>
    %cst_6 = arith.constant 14.2857141 : f32
    %14 = vector.broadcast %cst_6 : f32 to vector<8x1xf32>
    %15 = arith.mulf %13, %14 : vector<8x1xf32>
    %cst_7 = arith.constant dense<0xFF800000> : vector<8xf32>
    %16 = vector.multi_reduction <maximumf>, %4, %cst_7 [1] : vector<8x8xf32> to vector<8xf32>
    %17 = vector.shape_cast %16 : vector<8xf32> to vector<8x1xf32>
    %18 = vector.broadcast %17 : vector<8x1xf32> to vector<8x8xf32>
    %19 = arith.subf %4, %18 : vector<8x8xf32>
    %20 = arith.truncf %19 : vector<8x8xf32> to vector<8x8xbf16>
    %21 = math.exp %20 : vector<8x8xbf16>
    %22 = arith.extf %21 : vector<8x8xbf16> to vector<8x8xf32>
    %cst_8 = arith.constant dense<0.000000e+00> : vector<8xf32>
    %23 = vector.multi_reduction <add>, %22, %cst_8 [1] : vector<8x8xf32> to vector<8xf32>
    %24 = vector.shape_cast %23 : vector<8xf32> to vector<8x1xf32>
    %25 = math.log %24 : vector<8x1xf32>
    %26 = arith.addf %17, %25 : vector<8x1xf32>
    %27 = arith.subf %26, %15 : vector<8x1xf32>
    %28 = tpu.transpose %27, [1, 0] : vector<8x1xf32> -> vector<1x8xf32>
    %29 = vector.shape_cast %28 : vector<1x8xf32> to vector<1x1x8xf32>
    %c0_9 = arith.constant 0 : index
    %c0_10 = arith.constant 0 : index
    %c0_11 = arith.constant 0 : index
    %30 = vector.load %arg3[%c0_9, %c0_10, %c0_11] : memref<1x1x8xf32, #tpu.memory_space<vmem>>, vector<1x1x8xf32>
    tpu.vector_store %arg3[%c0_9, %c0_10, %c0_11], %29 {strides = array<i32>} : memref<1x1x8xf32, #tpu.memory_space<vmem>>, vector<1x1x8xf32>,
    return
  }
  func.func @transform_0(%arg0: i32) -> (i32, i32) {
    %c0_i32 = arith.constant 0 : i32
    %c0_i32_0 = arith.constant 0 : i32
    return %arg0, %c0_i32 : i32, i32
  }
  func.func @transform_1(%arg0: i32) -> (i32, i32) {
    %c0_i32 = arith.constant 0 : i32
    %c0_i32_0 = arith.constant 0 : i32
    %c0_i32_1 = arith.constant 0 : i32
    return %c0_i32, %c0_i32_0 : i32, i32
  }
  func.func @transform_2(%arg0: i32) -> (i32, i32, i32) {
    %c0_i32 = arith.constant 0 : i32
    %c0_i32_0 = arith.constant 0 : i32
    %c0_i32_1 = arith.constant 0 : i32
    return %arg0, %c0_i32, %c0_i32_0 : i32, i32, i32
  }
}

</mosaic_0001>

<bundles_post_ra>
// kernel: tpu_custom_call.1
= control target key start
LH: loop header
LB: loop body
LE: loop exit
PB: predicated region body
PF: predicated region fallthrough
CT: control target
= control target key end

     0   :  { %7 = vsyncpa [#allocation3], 0  ;;  %s320_s0 = inlined_call_operand.hbm [shape: bf16[8,32], index: 0, kind: input, shape index: {}]   ;;  %s321_s1 = inlined_call_operand.hbm [shape: bf16[8,32], index: 1, kind: input, shape index: {}]   ;;  %s322_s2 = inlined_call_operand.hbm [shape: f32[1,1,8], index: 2, kind: output, shape index: {}]  }
   0x1   :  { %8 = vsyncpa [#allocation6], 0 }
   0x2   :  { %9 = vsyncpa [#allocation4], 0  ;;  %s259_s9 = smov [#allocation2]   ;;  %s260_s11 = smov [#allocation5]  }
   0x3   :  { %s16_s10 = sshll.u32 %s259_s9, 4  ;;  %s26_s12 = sshll.u32 %s260_s11, 4  ;;  %s17_s10 = int_to_ptr.vmem [resolvable:$true] %s16_s10  ;;  %s27_s12 = int_to_ptr.vmem [resolvable:$true] %s26_s12 }
   0x4   :  { %s187_s15 = scalar_lea.hbm %s320_s0, 64 }
   0x5   :  { %p188_p0 = scmp.ne.s32.totalorder %s320_s0, %s187_s15  ;;  %p191_p1 = scmp.lt.u32.totalorder %s187_s15, %s320_s0 }
   0x7   :  { %p193_p2 = pnand %p191_p1, %p188_p0 }
   0x9   :  { %196 = shalt.err (!%p193_p2)
}
   0xa   :  { %s197_s20 = scalar_lea.vmem %s17_s10, 64  ;;  %p202_p4 = scmp.lt.s32.totalorder %s17_s10, %s17_s10 }
   0xb   :  { %p198_p3 = scmp.ne.s32.totalorder %s17_s10, %s197_s20  ;;  %p203_p5 = scmp.lt.s32.totalorder %s197_s20, %s197_s20 }
   0xd   :  { %p204_p6 = por %p203_p5, %p202_p4 }
   0xf   :  { %p205_p7 = pnand %p204_p6, %p198_p3 }
  0x11   :  { %208 = shalt.err (!%p205_p7)
}
  0x12   :  { %19 = dma.hbm_to_vmem [thread:$0]  %s320_s0, 64, %s17_s10, [#allocation3]  }
  0x13   :  { %s209_s25 = scalar_lea.hbm %s321_s1, 64 }
  0x14   :  { %p210_p8 = scmp.ne.s32.totalorder %s321_s1, %s209_s25  ;;  %p213_p9 = scmp.lt.u32.totalorder %s209_s25, %s321_s1 }
  0x16   :  { %p215_p10 = pnand %p213_p9, %p210_p8 }
  0x18   :  { %218 = shalt.err (!%p215_p10)
}
  0x19   :  { %s219_s30 = scalar_lea.vmem %s27_s12, 64  ;;  %p224_p12 = scmp.lt.s32.totalorder %s27_s12, %s27_s12 }
  0x1a   :  { %p220_p11 = scmp.ne.s32.totalorder %s27_s12, %s219_s30  ;;  %p225_p13 = scmp.lt.s32.totalorder %s219_s30, %s219_s30 }
  0x1c   :  { %p226_p0 = por %p225_p13, %p224_p12 }
  0x1e   :  { %p227_p1 = pnand %p226_p0, %p220_p11 }
  0x20   :  { %230 = shalt.err (!%p227_p1)
}
  0x21   :  { %29 = dma.hbm_to_vmem [thread:$0]  %s321_s1, 64, %s27_s12, [#allocation6]  }
  0x22   :  { %253 = dma.done.wait [#allocation3], 64  }
  0x23   :  { %254 = vsyncadd [#allocation3], 4294967232 }
  0x24   :  { %255 = dma.done.wait [#allocation6], 64  }
  0x25   :  { %256 = vsyncadd [#allocation6], 4294967232  ;;  %v261_v0 = vmov 0.0   ;;  %vm262_vm0 = vmmov 0   ;;  %vm39_vm1 = vcmask 261120   ;;  %vm100_vm2 = vcmask 64512  }
  0x26   :  { %172 = vmatprep.subr.bf16.mxu0 %v261_v0  ;;  %174 = vmatprep.mubr.msk.bf16.mxu0 %vm262_vm0, %v261_v0  ;;  %v38_v1 = vld [vmem:[#allocation5] sm:$0xf]  ;;  %v37_v3 = vld [vmem:[#allocation2] sm:$0xf]  ;;  %s263_s1 = smov [#allocation7]   ;;  %vm149_vm3 = vcmask 57344  }
  0x27   :  { %v44_v2 = vsel %vm39_vm1, %v38_v1, 0  ;;  %v92_v10 = vld [vmem:[#allocation5] sm:$0xf]  ;;  %v93_v11 = vunpack.c.l.bf16 %v37_v3  ;;  %s157_s4 = sshll.u32 %s263_s1, 4  ;;  %s158_s4 = int_to_ptr.vmem [resolvable:$true] %s157_s4 }
  0x28   :  { %173 = vmatpush3.bf16.xpose.msra.mxu0 %v44_v2  ;;  %v94_v12 = vunpack.c.l.bf16 %v92_v10  ;;  %s231_s5 = scalar_lea.vmem %s158_s4, 16  ;;  %s235_s6 = scalar_lea.vmem %s158_s4, 32 }
  0x29   :  { %p232_p2 = scmp.ne.s32.totalorder %s158_s4, %s231_s5  ;;  %p236_p3 = scmp.lt.s32.totalorder %s158_s4, %s158_s4 }
  0x2a   :  { %v95_v13 = vmul.f32 %v94_v12, %v93_v11  ;;  %p237_p4 = scmp.lt.s32.totalorder %s235_s6, %s231_s5 }
  0x2c   :  { %v96_v14 = vsel %vm39_vm1, %v95_v13, 0.0  ;;  %p238_p5 = por %p237_p4, %p236_p3 }
  0x2d   :  { %97 = vadd.xlane.f32.xlu1 %v96_v14 }
  0x2e   :  { %p239_p6 = pnand %p238_p5, %p232_p2 }
  0x2f   :  { %175 = vmatmul.mubr.msk.bf16.vlgmr.msra.gmra.mrb[0].mxu0 %vm39_vm1, %v37_v3 }
  0xba   :  { %v98_v23 = vpop.xlane.xlu1 %97 }
  0xbb   :  { %v99_v26 = vmul.f32 14.285714, %v98_v23 }
 0x102   :  { %v80_v4 = vpop.f32.mrb[0].mxu0 }
 0x103   :  { %v86_v5 = vmul.f32 14.285714, %v80_v4  ;;  %v176_v6 = vpop.f32.mrb[1].mxu0 }
 0x104   :  { %v83_v7 = vpop.f32.mrb[2].mxu0 }
 0x105   :  { %v177_v8 = vpop.f32.mrb[3].mxu0  ;;  %v101_v9 = vsel %vm100_vm2, %v86_v5, -inf }
 0x106   :  { %102 = vmax.xlane.f32.xlu0 %v101_v9 }
 0x193   :  { %v103_v15 = vpop.xlane.xlu0 %102 }
 0x194   :  { %v104_v16 = vsub.f32 %v86_v5, %v103_v15 }
 0x196   :  { %v105_v17 = vpack.c.bf16 %v104_v16, %v104_v16 }
 0x198   :  { %v107_v18 = vmul.bf16 1069105081, %v105_v17 }
 0x19a   :  { %183 = vpow.bf16 %v107_v18 }
 0x1a5   :  { %v184_v19 = vpop.eup %183 }
 0x1a6   :  { %v109_v20 = vunpack.c.l.bf16 %v184_v19 }
 0x1a8   :  { %v110_v21 = vsel %vm100_vm2, %v109_v20, 0.0 }
 0x1a9   :  { %111 = vadd.xlane.f32.xlu0 %v110_v21 }
 0x236   :  { %v112_v22 = vpop.xlane.xlu0 %111 }
 0x237   :  { %185 = vlog2.f32 %v112_v22 }
 0x241   :  { %v186_v24 = vpop.eup %185 }
 0x242   :  { %v114_v25 = vmul.f32 0.6931472, %v186_v24 }
 0x244   :  { %v115_v27 = vadd.f32 %v114_v25, %v103_v15 }
 0x246   :  { %v116_v28 = vsub.f32 %v115_v27, %v99_v26 }
 0x248   :  { %117 = vxpose.xlu1.b32.start.end [1/1] (short) (narrow) %v116_v28, 8 }
 0x2c8   :  { %v133_v29 = vpop.trf.xlu1 }
 0x2c9   :  { %150 = vst.msk [vmem:[#allocation7] sm:$0x1] %vm149_vm3, %v133_v29 }
 0x2ca   :  { %242 = shalt.err (!%p239_p6)
}
 0x2cb   :  { %s243_s9 = scalar_lea.hbm %s322_s2, 16 }
 0x2cc   :  { %p244_p7 = scmp.ne.s32.totalorder %s322_s2, %s243_s9  ;;  %p247_p8 = scmp.lt.u32.totalorder %s243_s9, %s322_s2 }
 0x2ce   :  { %p249_p9 = pnand %p247_p8, %p244_p7 }
 0x2d0   :  { %252 = shalt.err (!%p249_p9)
}
 0x2d1   :  { %160 = dma.vmem_to_hbm [thread:$0]  %s158_s4, 16, %s322_s2, [#allocation4]  }
 0x2d2   :  { %257 = dma.done.wait [#allocation4], 16  }
 0x2d3   :  { %258 = vsyncadd [#allocation4], 4294967280 }
 0x2d4   :  { %164 = vsyncpa [#allocation3], 1 }
 0x2d5   :  { %165 = vsyncpa [#allocation6], 1 }
 0x2d6   :  { %166 = vsyncpa [#allocation4], 1 }

</bundles_post_ra>
